<compile_context>
chip_gen: v7x
topology: tpu7x:2x2x1
jax: 0.10.0
libtpu: 0.0.40
codegen_flags: <defaults>
</compile_context>

<pallas_src>
import functools

import jax
import jax.numpy as jnp
from jax.experimental import pallas as pl
from jax.experimental.pallas import tpu as pltpu

_SUBLANE = 8
_LANE = 128
_MAX_UNROLL_T = 16


def _encoder_kernel_unrolled(x_ref, w_ih_t_ref, b_ih_ref, w_hh_t_ref,
                             w_ro_t_ref, b_ro_ref, w_l_t_ref, b_l_ref,
                             he_ref, *, seq_len, batch_pad):
    """Whole encoder forward, T statically unrolled, states kept in vregs.

    x_ref:  (T*Bp, Dp) bf16, seq-major rows (row = t*Bp + b)
    he_ref: (T*Bp, Zp) f32, written once (full-tile, lane-dense)
    """
    # --- Hoisted input projection: one bf16 MXU matmul over the whole slab.
    xproj = (jnp.dot(x_ref[...], w_ih_t_ref[...],
                     preferred_element_type=jnp.float32)
             + b_ih_ref[...])                      # (T*Bp, Hp) f32

    w_hh_t = w_hh_t_ref[...]                       # (Hp, Hp) f32, loaded once
    hidden = w_hh_t.shape[0]

    # --- Serial recurrence in f32; h and the full state history stay in vregs.
    h = jnp.zeros((batch_pad, hidden), jnp.float32)
    states = []
    for t in range(seq_len):                       # static unroll (T <= 16)
        lo = t * batch_pad                         # tile-aligned static slice
        h = jnp.maximum(
            xproj[lo:lo + batch_pad, :]
            + jnp.dot(h, w_hh_t, preferred_element_type=jnp.float32),
            0.0)
        states.append(h)
    states = jnp.concatenate(states, axis=0)       # (T*Bp, Hp), still in vregs

    # --- Hoisted readout + encoder head: two bf16 matmuls, one dense store.
    o = (jnp.dot(states.astype(jnp.bfloat16), w_ro_t_ref[...],
                 preferred_element_type=jnp.float32) + b_ro_ref[...])
    he = (jnp.dot(jnp.maximum(o, 0.0).astype(jnp.bfloat16), w_l_t_ref[...],
                  preferred_element_type=jnp.float32) + b_l_ref[...])
    he_ref[...] = he.astype(he_ref.dtype)


def _encoder_kernel_looped(x_ref, w_ih_t_ref, b_ih_ref, w_hh_t_ref,
                           w_ro_t_ref, b_ro_ref, w_l_t_ref, b_l_ref,
                           he_ref, xp_ref, states_ref, *, seq_len, batch_pad):
    """Fallback for large T: fori_loop recurrence, states in VMEM scratch."""
    hidden = w_hh_t_ref.shape[0]
    xproj = (jnp.dot(x_ref[...], w_ih_t_ref[...],
                     preferred_element_type=jnp.float32) + b_ih_ref[...])
    xp_ref[...] = xproj.reshape(seq_len, batch_pad, hidden)

    w_hh_t = w_hh_t_ref[...]

    def body(t, h):
        h = jnp.maximum(
            xp_ref[t] + jnp.dot(h, w_hh_t, preferred_element_type=jnp.float32),
            0.0)
        states_ref[t] = h
        return h

    jax.lax.fori_loop(0, seq_len, body,
                      jnp.zeros((batch_pad, hidden), jnp.float32), unroll=4)

    states = states_ref[...].reshape(seq_len * batch_pad, hidden)
    o = (jnp.dot(states.astype(jnp.bfloat16), w_ro_t_ref[...],
                 preferred_element_type=jnp.float32) + b_ro_ref[...])
    he = (jnp.dot(jnp.maximum(o, 0.0).astype(jnp.bfloat16), w_l_t_ref[...],
                  preferred_element_type=jnp.float32) + b_l_ref[...])
    he_ref[...] = he.astype(he_ref.dtype)


def _round_up(n, m):
    return ((n + m - 1) // m) * m


def _pad2(a, rows, cols):
    return jnp.pad(a, ((0, rows - a.shape[0]), (0, cols - a.shape[1])))


@functools.partial(jax.jit, static_argnames=("z_dim",))
def reservior_encoder(x, params, z_dim):
    """x: (B, T, 1, H, W) float32.  Returns (mu, log_var): (T, B, z_dim//2)."""
    B, T = x.shape[0], x.shape[1]
    D = x.shape[3] * x.shape[4]

    w_ih, b_ih, w_hh, w_ro, b_ro, w_l, b_l = (
        params["w_ih"], params["b_ih"], params["w_hh"],
        params["w_ro"], params["b_ro"], params["w_l"], params["b_l"])
    Hd, Od, Z = w_ih.shape[0], w_ro.shape[0], z_dim

    # Pad batch to the sublane width and all feature dims to the lane width so
    # every in-kernel slice / store is a full (8,128) tile.
    Bp = _round_up(B, _SUBLANE)
    Dp = _round_up(D, _LANE)
    Hp = _round_up(Hd, _LANE)
    Op = _round_up(Od, _LANE)
    Zp = _round_up(Z, _LANE)

    # Glue: NTCHW -> (T, B, D) seq-major, zero-pad batch/features, flatten.
    # (The full-input transpose is ~T*B*D*4 bytes; negligible here and fused
    #  with the pad/reshape by XLA.)
    x_seq = jnp.transpose(x.reshape(B, T, D), (1, 0, 2))
    x_seq = jnp.pad(x_seq, ((0, 0), (0, Bp - B), (0, Dp - D)))
    x2d = x_seq.reshape(T * Bp, Dp).astype(jnp.bfloat16)

    # Pre-transposed, zero-padded weights.  Zero padding keeps the padded lanes
    # of the hidden state exactly zero through the recurrence and the readout.
    w_ih_t = _pad2(w_ih.T, Dp, Hp).astype(jnp.bfloat16)         # (Dp, Hp)
    w_hh_t = _pad2(w_hh.T, Hp, Hp).astype(jnp.float32)          # (Hp, Hp) f32
    w_ro_t = _pad2(w_ro.T, Hp, Op).astype(jnp.bfloat16)         # (Hp, Op)
    w_l_t = _pad2(w_l.T, Op, Zp).astype(jnp.bfloat16)           # (Op, Zp)
    b_ih2 = jnp.pad(b_ih, (0, Hp - Hd)).reshape(1, Hp).astype(jnp.float32)
    b_ro2 = jnp.pad(b_ro, (0, Op - Od)).reshape(1, Op).astype(jnp.float32)
    b_l2 = jnp.pad(b_l, (0, Zp - Z)).reshape(1, Zp).astype(jnp.float32)

    vmem = pl.BlockSpec(memory_space=pltpu.MemorySpace.VMEM)

    if T <= _MAX_UNROLL_T:
        kernel = functools.partial(_encoder_kernel_unrolled,
                                   seq_len=T, batch_pad=Bp)
        scratch = []
    else:
        kernel = functools.partial(_encoder_kernel_looped,
                                   seq_len=T, batch_pad=Bp)
        scratch = [pltpu.VMEM((T, Bp, Hp), jnp.float32),    # xproj
                   pltpu.VMEM((T, Bp, Hp), jnp.float32)]    # states

    flops = 2 * T * Bp * (Dp * Hp + Hp * Hp + Hp * Op + Op * Zp)
    bytes_accessed = (T * Bp * Dp * 2 + Dp * Hp * 2 + Hp * Hp * 4
                      + Hp * Op * 2 + Op * Zp * 2
                      + 4 * (Hp + Op + Zp) + T * Bp * Zp * 4)
    # Explicit VMEM budget (safe headroom; well under v7x's 64 MiB at scale
    # rules re-derived here instead of relying on the default scoped limit).
    vmem_need = bytes_accessed + 3 * T * Bp * Hp * 4
    vmem_limit = int(min(max(2 * vmem_need, 4 * 1024 * 1024), 48 * 1024 * 1024))

    he2d = pl.pallas_call(
        kernel,
        out_shape=jax.ShapeDtypeStruct((T * Bp, Zp), jnp.float32),
        in_specs=[vmem] * 8,                  # whole arrays resident in VMEM
        out_specs=vmem,
        scratch_shapes=scratch,
        cost_estimate=pl.CostEstimate(flops=flops, transcendentals=0,
                                      bytes_accessed=bytes_accessed),
        compiler_params=pltpu.CompilerParams(vmem_limit_bytes=vmem_limit),
    )(x2d, w_ih_t, b_ih2, w_hh_t, w_ro_t, b_ro2, w_l_t, b_l2)

    # Slice away batch / lane padding, then torch.chunk(.., 2, dim=2).
    he = he2d.reshape(T, Bp, Zp)[:, :B, :Z]
    half = Z // 2
    return he[:, :, :half], he[:, :, half:]


def _reference(x, params, z_dim):
    """Pure-JAX f32 reference of the same forward (correctness check)."""
    B, T = x.shape[0], x.shape[1]
    D = x.shape[3] * x.shape[4]
    x_seq = jnp.transpose(x.reshape(B, T, D), (1, 0, 2))
    Hd = params["w_ih"].shape[0]

    def step(h, xt):
        h_new = jax.nn.relu(xt @ params["w_ih"].T + params["b_ih"]
                            + h @ params["w_hh"].T)
        return h_new, h_new

    h0 = jnp.zeros((B, Hd), jnp.float32)
    _, states = jax.lax.scan(step, h0, x_seq)            # (T, B, Hd)
    o = states @ params["w_ro"].T + params["b_ro"]       # (T, B, Od)
    he = jax.nn.relu(o) @ params["w_l"].T + params["b_l"]
    half = z_dim // 2
    return he[:, :, :half], he[:, :, half:]


def init_params(key, input_dim, hidden_dim, output_dim, z_dim):
    ks = jax.random.split(key, 7)
    u = lambda k, shape, s: jax.random.uniform(k, shape, jnp.float32, -s, s)
    # Synthetic deterministic reservoir init; spectral-radius rescale
    # approximated with a small uniform scale to keep dynamics bounded.
    s_in = 1.0 / float(input_dim) ** 0.5
    s_hh = 0.9 / float(hidden_dim) ** 0.5
    s_ro = 1.0 / float(hidden_dim) ** 0.5
    s_l = 1.0 / float(output_dim) ** 0.5
    w_ih = u(ks[0], (hidden_dim, input_dim), s_in)
    b_ih = u(ks[1], (hidden_dim,), s_in)
    w_hh = u(ks[2], (hidden_dim, hidden_dim), s_hh)
    w_ro = u(ks[3], (output_dim, hidden_dim), s_ro)       # nn.Linear(Hd, Od)
    b_ro = u(ks[4], (output_dim,), s_ro)
    w_l = u(ks[5], (z_dim, output_dim), s_l)              # nn.Linear(Od, Z)
    b_l = u(ks[6], (z_dim,), s_l)
    return {"w_ih": w_ih, "b_ih": b_ih, "w_hh": w_hh,
            "w_ro": w_ro, "b_ro": b_ro, "w_l": w_l, "b_l": b_l}


if __name__ == "__main__":
    B, T, Hsp, Wsp = 2, 8, 16, 16        # input x: (B, T, 1, H, W)
    input_dim = Hsp * Wsp                # 256
    hidden_dim = 32
    output_dim = 32
    z_dim = 32                           # mu / log_var each (T, B, 16)

    key = jax.random.PRNGKey(0)
    kx, kp = jax.random.split(key)
    x = jax.random.normal(kx, (B, T, 1, Hsp, Wsp), jnp.float32)
    params = init_params(kp, input_dim, hidden_dim, output_dim, z_dim)

    mu, log_var = reservior_encoder(x, params, z_dim)
    jax.block_until_ready((mu, log_var))

    mu_ref, lv_ref = _reference(x, params, z_dim)
    assert mu.shape == (T, B, z_dim // 2) and log_var.shape == (T, B, z_dim // 2)

    def max_rel_err(a, b):
        return float(jnp.max(jnp.abs(a - b)) / (jnp.max(jnp.abs(b)) + 1e-6))

    # bf16 matmul operands -> compare against the f32 reference with a
    # magnitude-normalized tolerance.
    assert max_rel_err(mu, mu_ref) < 2e-2, max_rel_err(mu, mu_ref)
    assert max_rel_err(log_var, lv_ref) < 2e-2, max_rel_err(log_var, lv_ref)

    print("KERNEL_OK")
</pallas_src>

<mosaic_0001>
module attributes {stable_mosaic.version = 11 : i64} {
  func.func @_encoder_kernel_unrolled(%arg0: memref<64x256xbf16, #tpu.memory_space<vmem>>, %arg1: memref<256x128xbf16, #tpu.memory_space<vmem>>, %arg2: memref<1x128xf32, #tpu.memory_space<vmem>>, %arg3: memref<128x128xf32, #tpu.memory_space<vmem>>, %arg4: memref<128x128xbf16, #tpu.memory_space<vmem>>, %arg5: memref<1x128xf32, #tpu.memory_space<vmem>>, %arg6: memref<128x128xbf16, #tpu.memory_space<vmem>>, %arg7: memref<1x128xf32, #tpu.memory_space<vmem>>, %arg8: memref<64x128xf32, #tpu.memory_space<vmem>>) attributes {dimension_semantics = [], scalar_prefetch = 0 : i64, scratch_operands = 0 : i64, tpu.core_type = #tpu.core_type<tc>} {
    %c0 = arith.constant 0 : index
    %c0_0 = arith.constant 0 : index
    %0 = vector.load %arg0[%c0, %c0_0] : memref<64x256xbf16, #tpu.memory_space<vmem>>, vector<64x256xbf16>
    %c0_1 = arith.constant 0 : index
    %c0_2 = arith.constant 0 : index
    %1 = vector.load %arg1[%c0_1, %c0_2] : memref<256x128xbf16, #tpu.memory_space<vmem>>, vector<256x128xbf16>
    %cst = arith.constant dense<0.000000e+00> : vector<64x128xf32>
    %2 = tpu.matmul %0, %1, %cst {dimension_numbers = #tpu.dot_dimension_numbers<[1], [0], [0], [1], [0, 0, 1, 1], [], []>} : vector<64x256xbf16>, vector<256x128xbf16>, vector<64x128xf32> -> vector<64x128xf32>
    %c0_3 = arith.constant 0 : index
    %c0_4 = arith.constant 0 : index
    %3 = vector.load %arg2[%c0_3, %c0_4] : memref<1x128xf32, #tpu.memory_space<vmem>>, vector<1x128xf32>
    %4 = vector.broadcast %3 : vector<1x128xf32> to vector<64x128xf32>
    %5 = arith.addf %2, %4 : vector<64x128xf32>
    %c0_5 = arith.constant 0 : index
    %c0_6 = arith.constant 0 : index
    %6 = vector.load %arg3[%c0_5, %c0_6] : memref<128x128xf32, #tpu.memory_space<vmem>>, vector<128x128xf32>
    %cst_7 = arith.constant 0.000000e+00 : f32
    %7 = vector.broadcast %cst_7 : f32 to vector<8x128xf32>
    %8 = vector.extract_strided_slice %5 {offsets = [0, 0], sizes = [8, 128], strides = [1, 1]} : vector<64x128xf32> to vector<8x128xf32>
    %cst_8 = arith.constant dense<0.000000e+00> : vector<8x128xf32>
    %9 = tpu.matmul %7, %6, %cst_8 {dimension_numbers = #tpu.dot_dimension_numbers<[1], [0], [0], [1], [0, 0, 1, 1], [], []>} : vector<8x128xf32>, vector<128x128xf32>, vector<8x128xf32> -> vector<8x128xf32>
    %10 = arith.addf %8, %9 : vector<8x128xf32>
    %cst_9 = arith.constant 0.000000e+00 : f32
    %11 = vector.broadcast %cst_9 : f32 to vector<8x128xf32>
    %12 = arith.maximumf %10, %11 : vector<8x128xf32>
    %13 = vector.extract_strided_slice %5 {offsets = [8, 0], sizes = [8, 128], strides = [1, 1]} : vector<64x128xf32> to vector<8x128xf32>
    %cst_10 = arith.constant dense<0.000000e+00> : vector<8x128xf32>
    %14 = tpu.matmul %12, %6, %cst_10 {dimension_numbers = #tpu.dot_dimension_numbers<[1], [0], [0], [1], [0, 0, 1, 1], [], []>} : vector<8x128xf32>, vector<128x128xf32>, vector<8x128xf32> -> vector<8x128xf32>
    %15 = arith.addf %13, %14 : vector<8x128xf32>
    %cst_11 = arith.constant 0.000000e+00 : f32
    %16 = vector.broadcast %cst_11 : f32 to vector<8x128xf32>
    %17 = arith.maximumf %15, %16 : vector<8x128xf32>
    %18 = vector.extract_strided_slice %5 {offsets = [16, 0], sizes = [8, 128], strides = [1, 1]} : vector<64x128xf32> to vector<8x128xf32>
    %cst_12 = arith.constant dense<0.000000e+00> : vector<8x128xf32>
    %19 = tpu.matmul %17, %6, %cst_12 {dimension_numbers = #tpu.dot_dimension_numbers<[1], [0], [0], [1], [0, 0, 1, 1], [], []>} : vector<8x128xf32>, vector<128x128xf32>, vector<8x128xf32> -> vector<8x128xf32>
    %20 = arith.addf %18, %19 : vector<8x128xf32>
    %cst_13 = arith.constant 0.000000e+00 : f32
    %21 = vector.broadcast %cst_13 : f32 to vector<8x128xf32>
    %22 = arith.maximumf %20, %21 : vector<8x128xf32>
    %23 = vector.extract_strided_slice %5 {offsets = [24, 0], sizes = [8, 128], strides = [1, 1]} : vector<64x128xf32> to vector<8x128xf32>
    %cst_14 = arith.constant dense<0.000000e+00> : vector<8x128xf32>
    %24 = tpu.matmul %22, %6, %cst_14 {dimension_numbers = #tpu.dot_dimension_numbers<[1], [0], [0], [1], [0, 0, 1, 1], [], []>} : vector<8x128xf32>, vector<128x128xf32>, vector<8x128xf32> -> vector<8x128xf32>
    %25 = arith.addf %23, %24 : vector<8x128xf32>
    %cst_15 = arith.constant 0.000000e+00 : f32
    %26 = vector.broadcast %cst_15 : f32 to vector<8x128xf32>
    %27 = arith.maximumf %25, %26 : vector<8x128xf32>
    %28 = vector.extract_strided_slice %5 {offsets = [32, 0], sizes = [8, 128], strides = [1, 1]} : vector<64x128xf32> to vector<8x128xf32>
    %cst_16 = arith.constant dense<0.000000e+00> : vector<8x128xf32>
    %29 = tpu.matmul %27, %6, %cst_16 {dimension_numbers = #tpu.dot_dimension_numbers<[1], [0], [0], [1], [0, 0, 1, 1], [], []>} : vector<8x128xf32>, vector<128x128xf32>, vector<8x128xf32> -> vector<8x128xf32>
    %30 = arith.addf %28, %29 : vector<8x128xf32>
    %cst_17 = arith.constant 0.000000e+00 : f32
    %31 = vector.broadcast %cst_17 : f32 to vector<8x128xf32>
    %32 = arith.maximumf %30, %31 : vector<8x128xf32>
    %33 = vector.extract_strided_slice %5 {offsets = [40, 0], sizes = [8, 128], strides = [1, 1]} : vector<64x128xf32> to vector<8x128xf32>
    %cst_18 = arith.constant dense<0.000000e+00> : vector<8x128xf32>
    %34 = tpu.matmul %32, %6, %cst_18 {dimension_numbers = #tpu.dot_dimension_numbers<[1], [0], [0], [1], [0, 0, 1, 1], [], []>} : vector<8x128xf32>, vector<128x128xf32>, vector<8x128xf32> -> vector<8x128xf32>
    %35 = arith.addf %33, %34 : vector<8x128xf32>
    %cst_19 = arith.constant 0.000000e+00 : f32
    %36 = vector.broadcast %cst_19 : f32 to vector<8x128xf32>
    %37 = arith.maximumf %35, %36 : vector<8x128xf32>
    %38 = vector.extract_strided_slice %5 {offsets = [48, 0], sizes = [8, 128], strides = [1, 1]} : vector<64x128xf32> to vector<8x128xf32>
    %cst_20 = arith.constant dense<0.000000e+00> : vector<8x128xf32>
    %39 = tpu.matmul %37, %6, %cst_20 {dimension_numbers = #tpu.dot_dimension_numbers<[1], [0], [0], [1], [0, 0, 1, 1], [], []>} : vector<8x128xf32>, vector<128x128xf32>, vector<8x128xf32> -> vector<8x128xf32>
    %40 = arith.addf %38, %39 : vector<8x128xf32>
    %cst_21 = arith.constant 0.000000e+00 : f32
    %41 = vector.broadcast %cst_21 : f32 to vector<8x128xf32>
    %42 = arith.maximumf %40, %41 : vector<8x128xf32>
    %43 = vector.extract_strided_slice %5 {offsets = [56, 0], sizes = [8, 128], strides = [1, 1]} : vector<64x128xf32> to vector<8x128xf32>
    %cst_22 = arith.constant dense<0.000000e+00> : vector<8x128xf32>
    %44 = tpu.matmul %42, %6, %cst_22 {dimension_numbers = #tpu.dot_dimension_numbers<[1], [0], [0], [1], [0, 0, 1, 1], [], []>} : vector<8x128xf32>, vector<128x128xf32>, vector<8x128xf32> -> vector<8x128xf32>
    %45 = arith.addf %43, %44 : vector<8x128xf32>
    %cst_23 = arith.constant 0.000000e+00 : f32
    %46 = vector.broadcast %cst_23 : f32 to vector<8x128xf32>
    %47 = arith.maximumf %45, %46 : vector<8x128xf32>
    %48 = tpu.concatenate %12, %17, %22, %27, %32, %37, %42, %47 in 0 : vector<8x128xf32>, vector<8x128xf32>, vector<8x128xf32>, vector<8x128xf32>, vector<8x128xf32>, vector<8x128xf32>, vector<8x128xf32>, vector<8x128xf32> -> vector<64x128xf32>
    %49 = arith.truncf %48 : vector<64x128xf32> to vector<64x128xbf16>
    %c0_24 = arith.constant 0 : index
    %c0_25 = arith.constant 0 : index
    %50 = vector.load %arg4[%c0_24, %c0_25] : memref<128x128xbf16, #tpu.memory_space<vmem>>, vector<128x128xbf16>
    %cst_26 = arith.constant dense<0.000000e+00> : vector<64x128xf32>
    %51 = tpu.matmul %49, %50, %cst_26 {dimension_numbers = #tpu.dot_dimension_numbers<[1], [0], [0], [1], [0, 0, 1, 1], [], []>} : vector<64x128xbf16>, vector<128x128xbf16>, vector<64x128xf32> -> vector<64x128xf32>
    %c0_27 = arith.constant 0 : index
    %c0_28 = arith.constant 0 : index
    %52 = vector.load %arg5[%c0_27, %c0_28] : memref<1x128xf32, #tpu.memory_space<vmem>>, vector<1x128xf32>
    %53 = vector.broadcast %52 : vector<1x128xf32> to vector<64x128xf32>
    %54 = arith.addf %51, %53 : vector<64x128xf32>
    %cst_29 = arith.constant 0.000000e+00 : f32
    %55 = vector.broadcast %cst_29 : f32 to vector<64x128xf32>
    %56 = arith.maximumf %54, %55 : vector<64x128xf32>
    %57 = arith.truncf %56 : vector<64x128xf32> to vector<64x128xbf16>
    %c0_30 = arith.constant 0 : index
    %c0_31 = arith.constant 0 : index
    %58 = vector.load %arg6[%c0_30, %c0_31] : memref<128x128xbf16, #tpu.memory_space<vmem>>, vector<128x128xbf16>
    %cst_32 = arith.constant dense<0.000000e+00> : vector<64x128xf32>
    %59 = tpu.matmul %57, %58, %cst_32 {dimension_numbers = #tpu.dot_dimension_numbers<[1], [0], [0], [1], [0, 0, 1, 1], [], []>} : vector<64x128xbf16>, vector<128x128xbf16>, vector<64x128xf32> -> vector<64x128xf32>
    %c0_33 = arith.constant 0 : index
    %c0_34 = arith.constant 0 : index
    %60 = vector.load %arg7[%c0_33, %c0_34] : memref<1x128xf32, #tpu.memory_space<vmem>>, vector<1x128xf32>
    %61 = vector.broadcast %60 : vector<1x128xf32> to vector<64x128xf32>
    %62 = arith.addf %59, %61 : vector<64x128xf32>
    %c0_35 = arith.constant 0 : index
    %c0_36 = arith.constant 0 : index
    %63 = vector.load %arg8[%c0_35, %c0_36] : memref<64x128xf32, #tpu.memory_space<vmem>>, vector<64x128xf32>
    tpu.vector_store %arg8[%c0_35, %c0_36], %62 {strides = array<i32>} : memref<64x128xf32, #tpu.memory_space<vmem>>, vector<64x128xf32>,
    return
  }
}

</mosaic_0001>

<bundles_post_ra>
// kernel: reservior_encoder.1
= control target key start
LH: loop header
LB: loop body
LE: loop exit
PB: predicated region body
PF: predicated region fallthrough
CT: control target
= control target key end

     0   :  { %v1996_v1 = vmov 0.0|0.0   ;;  %vm1997_vm0 = vmmov 0   ;;  %v1998_v2 = vmov 0.0   ;;  %s2459_s1 = inlined_call_operand.vmem [shape: bf16[256,128], index: 1, kind: input, shape index: {}]   ;;  %s2460_s3 = inlined_call_operand.vmem [shape: f32[128,128], index: 3, kind: input, shape index: {}]   ;;  %s2461_s0 = inlined_call_operand.vmem [shape: bf16[64,256], index: 0, kind: input, shape index: {}]   ;;  %s2462_s2 = inlined_call_operand.vmem [shape: f32[1,128], index: 2, kind: input, shape index: {}]   ;;  %s2463_s4 = inlined_call_operand.vmem [shape: bf16[128,128], index: 4, kind: input, shape index: {}]   ;;  %s2464_s6 = inlined_call_operand.vmem [shape: bf16[128,128], index: 6, kind: input, shape index: {}]   ;;  %s2465_s5 = inlined_call_operand.vmem [shape: f32[1,128], index: 5, kind: input, shape index: {}]   ;;  %s2466_s7 = inlined_call_operand.vmem [shape: f32[1,128], index: 7, kind: input, shape index: {}]   ;;  %s2467_s8 = inlined_call_operand.vmem [shape: f32[64,128], index: 8, kind: output, shape index: {}]  }
   0x1   :  { %v1952_v0 = vld [vmem:[%s2459_s1 + $0x40] sm:$0xff]   ;;  %1741 = vmatprep.subr.bf16.mxu1 %v1996_v1  ;;  %1445 = vmatprep.mubr.msk.f32.mxu1 %vm1997_vm0, %v1998_v2  ;;  %v1954_v4 = vld [vmem:[%s2459_s1 + $0x48] sm:$0xff]   ;;  %v1956_v9 = vld [vmem:[%s2459_s1 + $0x50] sm:$0xff]  }
   0x2   :  { %v1953_v3 = vld [vmem:[%s2459_s1] sm:$0xff]   ;;  %1213 = vmatprep.subr.bf16.mxu0 %v1952_v0  ;;  %v1955_v5 = vld [vmem:[%s2459_s1 + $0x8] sm:$0xff]   ;;  %v1957_v10 = vld [vmem:[%s2459_s1 + $0x10] sm:$0xff]  }
   0x3   :  { %1214 = vmatpush3.bf16.msra.mxu0 %v1953_v3  ;;  %v278_v6 = vld [vmem:[%s2460_s3] sm:$0xff]  ;;  %v279_v7 = vld [vmem:[%s2460_s3 + $0x8] sm:$0xff]  ;;  %v280_v11 = vld [vmem:[%s2460_s3 + $0x10] sm:$0xff] }
   0x4   :  { %1215 = vmatprep.subr.bf16.mxu0 %v1954_v4  ;;  %v2065_v8 = vpack.c.bf16 %v279_v7, %v278_v6  ;;  %v281_v12 = vld [vmem:[%s2460_s3 + $0x18] sm:$0xff]  ;;  %v282_v15 = vld [vmem:[%s2460_s3 + $0x20] sm:$0xff]  ;;  %v283_v16 = vld [vmem:[%s2460_s3 + $0x28] sm:$0xff] }
   0x5   :  { %v2081_v13 = vpack.c.bf16 %v281_v12, %v280_v11  ;;  %v1958_v14 = vld [vmem:[%s2459_s1 + $0x58] sm:$0xff]   ;;  %v2096_v18 = vpack.c.bf16 %v283_v16, %v282_v15  ;;  %v1960_v19 = vld [vmem:[%s2459_s1 + $0x60] sm:$0xff]   ;;  %v284_v20 = vld [vmem:[%s2460_s3 + $0x30] sm:$0xff] }
   0x6   :  { %1743 = vmatpush3.bf16.msra.mxu1 %v2065_v8  ;;  %v1959_v17 = vld [vmem:[%s2459_s1 + $0x18] sm:$0xff]   ;;  %v1961_v22 = vld [vmem:[%s2459_s1 + $0x20] sm:$0xff]   ;;  %v1962_v23 = vld [vmem:[%s2459_s1 + $0x68] sm:$0xff]  }
   0x7   :  { %1216 = vmatpush3.bf16.msra.mxu0 %v1955_v5  ;;  %1744 = vmatprep.subr.bf16.mxu1 %v1996_v1  ;;  %v285_v21 = vld [vmem:[%s2460_s3 + $0x38] sm:$0xff]  ;;  %v286_v25 = vld [vmem:[%s2460_s3 + $0x40] sm:$0xff]  ;;  %v287_v26 = vld [vmem:[%s2460_s3 + $0x48] sm:$0xff] }
   0x8   :  { %1217 = vmatprep.subr.bf16.mxu0 %v1956_v9  ;;  %v2115_v24 = vpack.c.bf16 %v285_v21, %v284_v20  ;;  %v1963_v27 = vld [vmem:[%s2459_s1 + $0x28] sm:$0xff]   ;;  %v2128_v28 = vpack.c.bf16 %v287_v26, %v286_v25  ;;  %v1964_v29 = vld [vmem:[%s2459_s1 + $0x70] sm:$0xff]   ;;  %v289_v31 = vld [vmem:[%s2460_s3 + $0x58] sm:$0xff] }
   0x9   :  { %v288_v30 = vld [vmem:[%s2460_s3 + $0x50] sm:$0xff]  ;;  %v1970_v32 = vld [vmem:[%s2461_s0 + $0x4] ss:$8 sps:$4 sm:$0xff]   ;;  %v1966_v35 = vld [vmem:[%s2459_s1 + $0x78] sm:$0xff]  }
   0xa   :  { %1746 = vmatpush3.bf16.msra.mxu1 %v2081_v13  ;;  %v1965_v33 = vld [vmem:[%s2459_s1 + $0x30] sm:$0xff]   ;;  %v2147_v34 = vpack.c.bf16 %v289_v31, %v288_v30  ;;  %v290_v36 = vld [vmem:[%s2460_s3 + $0x60] sm:$0xff]  ;;  %v291_v37 = vld [vmem:[%s2460_s3 + $0x68] sm:$0xff]  ;;  %245 = vmatprep.mubr.bf16.mxu0 %v1970_v32 }
   0xb   :  { %1218 = vmatpush3.bf16.msra.mxu0 %v1957_v10  ;;  %1747 = vmatprep.subr.bf16.mxu1 %v1996_v1  ;;  %v1967_v38 = vld [vmem:[%s2459_s1 + $0x38] sm:$0xff]   ;;  %v2163_v39 = vpack.c.bf16 %v291_v37, %v290_v36  ;;  %v292_v40 = vld [vmem:[%s2460_s3 + $0x70] sm:$0xff]  ;;  %v1968_v42 = vld [vmem:[%s2461_s0] ss:$8 sps:$4 sm:$0xff]  }
   0xc   :  { %1219 = vmatprep.subr.bf16.mxu0 %v1958_v14  ;;  %v293_v41 = vld [vmem:[%s2460_s3 + $0x78] sm:$0xff]  ;;  %v1974_v46 = vld [vmem:[%s2461_s0 + $0x24] ss:$8 sps:$4 sm:$0xff]   ;;  %v1976_v47 = vld [vmem:[%s2461_s0 + $0x20] ss:$8 sps:$4 sm:$0xff]  }
   0xd   :  { %v2176_v43 = vpack.c.bf16 %v293_v41, %v292_v40  ;;  %v1971_v44 = vld [vmem:[%s2461_s0 + $0x14] ss:$8 sps:$4 sm:$0xff]   ;;  %v1973_v45 = vld [vmem:[%s2461_s0 + $0x10] ss:$8 sps:$4 sm:$0xff]   ;;  %v2240_v52 = vld [vmem:[%s2462_s2] ss:$0 sm:$0xff] }
   0xe   :  { %1749 = vmatpush3.bf16.msra.mxu1 %v2096_v18  ;;  %v1977_v48 = vld [vmem:[%s2461_s0 + $0x34] ss:$8 sps:$4 sm:$0xff]   ;;  %v1979_v49 = vld [vmem:[%s2461_s0 + $0x30] ss:$8 sps:$4 sm:$0xff]  }
   0xf   :  { %1220 = vmatpush3.bf16.msra.mxu0 %v1959_v17  ;;  %1750 = vmatprep.subr.bf16.mxu1 %v1996_v1 }
  0x10   :  { %1221 = vmatprep.subr.bf16.mxu0 %v1960_v19 }
  0x12   :  { %1752 = vmatpush3.bf16.msra.mxu1 %v2115_v24 }
  0x13   :  { %1222 = vmatpush3.bf16.msra.mxu0 %v1961_v22  ;;  %1753 = vmatprep.subr.bf16.mxu1 %v1996_v1 }
  0x14   :  { %1223 = vmatprep.subr.bf16.mxu0 %v1962_v23 }
  0x16   :  { %1755 = vmatpush3.bf16.msra.mxu1 %v2128_v28 }
  0x17   :  { %1224 = vmatpush3.bf16.msra.mxu0 %v1963_v27  ;;  %1756 = vmatprep.subr.bf16.mxu1 %v1996_v1 }
  0x18   :  { %1225 = vmatprep.subr.bf16.mxu0 %v1964_v29 }
  0x1a   :  { %1758 = vmatpush3.bf16.msra.mxu1 %v2147_v34 }
  0x1b   :  { %1226 = vmatpush3.bf16.msra.mxu0 %v1965_v33  ;;  %1759 = vmatprep.subr.bf16.mxu1 %v1996_v1 }
  0x1c   :  { %1227 = vmatprep.subr.bf16.mxu0 %v1966_v35 }
  0x1e   :  { %1761 = vmatpush3.bf16.msra.mxu1 %v2163_v39 }
  0x1f   :  { %1228 = vmatpush3.bf16.msra.mxu0 %v1967_v38  ;;  %1762 = vmatprep.subr.bf16.mxu1 %v1996_v1 }
  0x20   :  { %1765 = vmatprep.subr.bf16.mxu0 %v1996_v1 }
  0x22   :  { %246 = vmatmul.mubr.bf16.vlgmr.msra.gmra.mrb[0].mxu0 %v1968_v42  ;;  %1764 = vmatpush3.bf16.msra.mxu1 %v2176_v43 }
  0x23   :  { %1767 = vmatpush3.bf16.msra.mxu0 %v2065_v8  ;;  %253 = vmatprep.mubr.bf16.mxu0 %v1971_v44 }
  0x24   :  { %1768 = vmatprep.subr.bf16.mxu0 %v1996_v1  ;;  %1789 = vmatprep.subr.bf16.mxu1 %v1996_v1 }
  0x25   :  { %1446 = vmatmul.mubr.f32.vlgmr.msra.gmra.mrb[0].mxu1 %v1998_v2 }
  0x26   :  { %1791 = vmatpush3.bf16.msra.mxu1 %v2065_v8  ;;  %1515 = vmatprep.mubr.msk.f32.mxu1 %vm1997_vm0, %v1998_v2 }
  0x27   :  { %1770 = vmatpush3.bf16.msra.mxu0 %v2081_v13  ;;  %1792 = vmatprep.subr.bf16.mxu1 %v1996_v1 }
  0x28   :  { %1771 = vmatprep.subr.bf16.mxu0 %v1996_v1 }
  0x2a   :  { %254 = vmatmul.mubr.bf16.gmra.mrb[4].mxu0 %v1973_v45  ;;  %1794 = vmatpush3.bf16.msra.mxu1 %v2081_v13 }
  0x2b   :  { %1773 = vmatpush3.bf16.msra.mxu0 %v2096_v18  ;;  %261 = vmatprep.mubr.bf16.mxu0 %v1974_v46  ;;  %v1984_v46 = vld [vmem:[%s2463_s4 + $0x20] sm:$0xff]  }
  0x2c   :  { %1774 = vmatprep.subr.bf16.mxu0 %v1996_v1  ;;  %1795 = vmatprep.subr.bf16.mxu1 %v1996_v1 }
  0x2e   :  { %1797 = vmatpush3.bf16.msra.mxu1 %v2096_v18 }
  0x2f   :  { %1776 = vmatpush3.bf16.msra.mxu0 %v2115_v24  ;;  %1798 = vmatprep.subr.bf16.mxu1 %v1996_v1 }
  0x30   :  { %1777 = vmatprep.subr.bf16.mxu0 %v1996_v1 }
  0x32   :  { %262 = vmatmul.mubr.bf16.gmra.mrb[8].mxu0 %v1976_v47  ;;  %1800 = vmatpush3.bf16.msra.mxu1 %v2115_v24  ;;  %v1985_v47 = vld [vmem:[%s2463_s4 + $0x28] sm:$0xff]  }
  0x33   :  { %1779 = vmatpush3.bf16.msra.mxu0 %v2128_v28  ;;  %269 = vmatprep.mubr.bf16.mxu0 %v1977_v48  ;;  %v1986_v48 = vld [vmem:[%s2463_s4 + $0x30] sm:$0xff]  }
  0x34   :  { %1780 = vmatprep.subr.bf16.mxu0 %v1996_v1  ;;  %1801 = vmatprep.subr.bf16.mxu1 %v1996_v1 }
  0x36   :  { %1803 = vmatpush3.bf16.msra.mxu1 %v2128_v28 }
  0x37   :  { %1782 = vmatpush3.bf16.msra.mxu0 %v2147_v34  ;;  %1804 = vmatprep.subr.bf16.mxu1 %v1996_v1 }
  0x38   :  { %1783 = vmatprep.subr.bf16.mxu0 %v1996_v1 }
  0x3a   :  { %270 = vmatmul.mubr.bf16.gmra.mrb[12].mxu0 %v1979_v49  ;;  %1806 = vmatpush3.bf16.msra.mxu1 %v2147_v34  ;;  %v1987_v49 = vld [vmem:[%s2463_s4 + $0x38] sm:$0xff]  }
  0x3b   :  { %1785 = vmatpush3.bf16.msra.mxu0 %v2163_v39  ;;  %1480 = vmatprep.mubr.msk.f32.mxu0 %vm1997_vm0, %v1998_v2 }
  0x3c   :  { %1786 = vmatprep.subr.bf16.mxu0 %v1996_v1  ;;  %1807 = vmatprep.subr.bf16.mxu1 %v1996_v1 }
  0x3e   :  { %1809 = vmatpush3.bf16.msra.mxu1 %v2163_v39 }
  0x3f   :  { %1788 = vmatpush3.bf16.msra.mxu0 %v2176_v43  ;;  %1810 = vmatprep.subr.bf16.mxu1 %v1996_v1 }
  0x40   :  { %1813 = vmatprep.subr.bf16.mxu0 %v1996_v1 }
  0x42   :  { %1812 = vmatpush3.bf16.msra.mxu1 %v2176_v43 }
  0x43   :  { %1837 = vmatprep.subr.bf16.mxu1 %v1996_v1 }
  0xf5   :  { %v1229_v50 = vpop.f32.mrb[0].mxu0 }
  0xf6   :  { %v1230_v51 = vpop.f32.mrb[1].mxu0 }
  0xf7   :  { %v1231_v53 = vadd.f32 %v1230_v51, %v1229_v50  ;;  %v1232_v54 = vpop.f32.mrb[2].mxu0 }
  0xf8   :  { %v1233_v55 = vpop.f32.mrb[3].mxu0  ;;  %v360_v58 = vpop.f32.mrb[0].mxu1 }
  0xf9   :  { %v1234_v56 = vadd.f32 %v1233_v55, %v1232_v54  ;;  %v248_v57 = vadd.f32 %v1231_v53, %v2240_v52  ;;  %v1447_v59 = vpop.f32.mrb[1].mxu1  ;;  %v1988_v53 = vld [vmem:[%s2464_s6] sm:$0xff]   ;;  %v1989_v54 = vld [vmem:[%s2464_s6 + $0x8] sm:$0xff]   ;;  %v1990_v55 = vld [vmem:[%s2464_s6 + $0x10] sm:$0xff]  }
  0xfa   :  { %v1994_v59 = vld [vmem:[%s2464_s6 + $0x30] sm:$0xff]  }
  0xfb   :  { %v2243_v60 = vadd.f32 %v360_v58, %v248_v57  ;;  %v251_v21 = vadd.f32 %v1234_v56, %v2240_v52  ;;  %v1991_v56 = vld [vmem:[%s2464_s6 + $0x18] sm:$0xff]   ;;  %v1992_v57 = vld [vmem:[%s2464_s6 + $0x20] sm:$0xff]   ;;  %v1993_v58 = vld [vmem:[%s2464_s6 + $0x28] sm:$0xff]  }
  0xfd   :  { %v365_v61 = vmax.f32 %v2243_v60, 0.0  ;;  %v1235_v62 = vpop.f32.mrb[4].mxu0  ;;  %v1995_v60 = vld [vmem:[%s2464_s6 + $0x38] sm:$0xff]  }
  0xfe   :  { %v1236_v63 = vpop.f32.mrb[5].mxu0 }
  0xff   :  { %1481 = vmatmul.mubr.f32.vlgmr.msra.gmra.mrb[16].mxu0 %v365_v61  ;;  %v1237_v0 = vadd.f32 %v1236_v63, %v1235_v62  ;;  %v1238_v3 = vpop.f32.mrb[6].mxu0 }
 0x100   :  { %v1239_v4 = vpop.f32.mrb[7].mxu0  ;;  %1815 = vmatpush3.bf16.msra.mxu0 %v2065_v8  ;;  %1550 = vmatprep.mubr.msk.f32.mxu0 %vm1997_vm0, %v1998_v2 }
 0x101   :  { %v2251_v5 = vadd.f32 %v1239_v4, %v1238_v3  ;;  %1816 = vmatprep.subr.bf16.mxu0 %v1996_v1  ;;  %v256_v27 = vadd.f32 %v1237_v0, %v2240_v52  ;;  %v1195_v4 = vld [vmem:[%s2465_s5] ss:$0 sm:$0xff] }
 0x103   :  { %v259_v33 = vadd.f32 %v2251_v5, %v2240_v52 }
 0x104   :  { %1818 = vmatpush3.bf16.msra.mxu0 %v2081_v13 }
 0x105   :  { %v1241_v6 = vpop.f32.mrb[8].mxu0  ;;  %1819 = vmatprep.subr.bf16.mxu0 %v1996_v1 }
 0x106   :  { %v1242_v7 = vpop.f32.mrb[9].mxu0 }
 0x107   :  { %v2256_v9 = vadd.f32 %v1242_v7, %v1241_v6  ;;  %v1244_v10 = vpop.f32.mrb[10].mxu0 }
 0x108   :  { %v1245_v11 = vpop.f32.mrb[11].mxu0  ;;  %1821 = vmatpush3.bf16.msra.mxu0 %v2096_v18 }
 0x109   :  { %v2259_v12 = vadd.f32 %v1245_v11, %v1244_v10  ;;  %1822 = vmatprep.subr.bf16.mxu0 %v1996_v1  ;;  %v264_v40 = vadd.f32 %v2256_v9, %v2240_v52 }
 0x10c   :  { %1824 = vmatpush3.bf16.msra.mxu0 %v2115_v24 }
 0x10d   :  { %v1247_v14 = vpop.f32.mrb[12].mxu0  ;;  %1825 = vmatprep.subr.bf16.mxu0 %v1996_v1 }
 0x10e   :  { %v1248_v15 = vpop.f32.mrb[13].mxu0 }
 0x10f   :  { %v2264_v16 = vadd.f32 %v1248_v15, %v1247_v14  ;;  %v1250_v17 = vpop.f32.mrb[14].mxu0 }
 0x110   :  { %v1251_v19 = vpop.f32.mrb[15].mxu0  ;;  %1827 = vmatpush3.bf16.msra.mxu0 %v2128_v28 }
 0x111   :  { %v2267_v20 = vadd.f32 %v1251_v19, %v1250_v17  ;;  %1828 = vmatprep.subr.bf16.mxu0 %v1996_v1 }
 0x114   :  { %1830 = vmatpush3.bf16.msra.mxu0 %v2147_v34 }
 0x115   :  { %1831 = vmatprep.subr.bf16.mxu0 %v1996_v1 }
 0x118   :  { %1833 = vmatpush3.bf16.msra.mxu0 %v2163_v39 }
 0x119   :  { %1834 = vmatprep.subr.bf16.mxu0 %v1996_v1 }
 0x11c   :  { %1836 = vmatpush3.bf16.msra.mxu0 %v2176_v43 }
 0x11d   :  { %1861 = vmatprep.subr.bf16.mxu0 %v1996_v1 }
 0x1d2   :  { %v432_v22 = vpop.f32.mrb[16].mxu0 }
 0x1d3   :  { %v2277_v23 = vadd.f32 %v432_v22, %v251_v21  ;;  %v1482_v25 = vpop.f32.mrb[17].mxu0 }
 0x1d5   :  { %v437_v26 = vmax.f32 %v2277_v23, 0.0  ;;  %v275_v23 = vadd.f32 %v2267_v20, %v2240_v52 }
 0x1d7   :  { %1516 = vmatmul.mubr.f32.vlgmr.msra.gmra.mrb[2].mxu1 %v437_v26 }
 0x1d8   :  { %1839 = vmatpush3.bf16.msra.mxu1 %v2065_v8  ;;  %1585 = vmatprep.mubr.msk.f32.mxu1 %vm1997_vm0, %v1998_v2 }
 0x1d9   :  { %1840 = vmatprep.subr.bf16.mxu1 %v1996_v1 }
 0x1dc   :  { %1842 = vmatpush3.bf16.msra.mxu1 %v2081_v13 }
 0x1dd   :  { %1843 = vmatprep.subr.bf16.mxu1 %v1996_v1 }
 0x1e0   :  { %1845 = vmatpush3.bf16.msra.mxu1 %v2096_v18 }
 0x1e1   :  { %1846 = vmatprep.subr.bf16.mxu1 %v1996_v1 }
 0x1e4   :  { %1848 = vmatpush3.bf16.msra.mxu1 %v2115_v24 }
 0x1e5   :  { %1849 = vmatprep.subr.bf16.mxu1 %v1996_v1 }
 0x1e8   :  { %1851 = vmatpush3.bf16.msra.mxu1 %v2128_v28 }
 0x1e9   :  { %1852 = vmatprep.subr.bf16.mxu1 %v1996_v1 }
 0x1ec   :  { %1854 = vmatpush3.bf16.msra.mxu1 %v2147_v34 }
 0x1ed   :  { %1855 = vmatprep.subr.bf16.mxu1 %v1996_v1 }
 0x1f0   :  { %1857 = vmatpush3.bf16.msra.mxu1 %v2163_v39 }
 0x1f1   :  { %1858 = vmatprep.subr.bf16.mxu1 %v1996_v1 }
 0x1f4   :  { %1860 = vmatpush3.bf16.msra.mxu1 %v2176_v43 }
 0x1f5   :  { %1885 = vmatprep.subr.bf16.mxu1 %v1996_v1 }
 0x2aa   :  { %v504_v29 = vpop.f32.mrb[2].mxu1 }
 0x2ab   :  { %v2301_v30 = vadd.f32 %v504_v29, %v256_v27  ;;  %v1517_v31 = vpop.f32.mrb[3].mxu1 }
 0x2ac   :  { %v1204_v31 = vld [vmem:[%s2466_s7] ss:$0 sm:$0xff] }
 0x2ad   :  { %v509_v32 = vmax.f32 %v2301_v30, 0.0 }
 0x2af   :  { %1551 = vmatmul.mubr.f32.vlgmr.msra.gmra.mrb[18].mxu0 %v509_v32 }
 0x2b0   :  { %1863 = vmatpush3.bf16.msra.mxu0 %v2065_v8  ;;  %1620 = vmatprep.mubr.msk.f32.mxu0 %vm1997_vm0, %v1998_v2 }
 0x2b1   :  { %1864 = vmatprep.subr.bf16.mxu0 %v1996_v1 }
 0x2b4   :  { %1866 = vmatpush3.bf16.msra.mxu0 %v2081_v13 }
 0x2b5   :  { %1867 = vmatprep.subr.bf16.mxu0 %v1996_v1 }
 0x2b8   :  { %1869 = vmatpush3.bf16.msra.mxu0 %v2096_v18 }
 0x2b9   :  { %1870 = vmatprep.subr.bf16.mxu0 %v1996_v1 }
 0x2bc   :  { %1872 = vmatpush3.bf16.msra.mxu0 %v2115_v24 }
 0x2bd   :  { %1873 = vmatprep.subr.bf16.mxu0 %v1996_v1 }
 0x2c0   :  { %1875 = vmatpush3.bf16.msra.mxu0 %v2128_v28 }
 0x2c1   :  { %1876 = vmatprep.subr.bf16.mxu0 %v1996_v1 }
 0x2c4   :  { %1878 = vmatpush3.bf16.msra.mxu0 %v2147_v34 }
 0x2c5   :  { %1879 = vmatprep.subr.bf16.mxu0 %v1996_v1 }
 0x2c8   :  { %1881 = vmatpush3.bf16.msra.mxu0 %v2163_v39 }
 0x2c9   :  { %1882 = vmatprep.subr.bf16.mxu0 %v1996_v1 }
 0x2cc   :  { %1884 = vmatpush3.bf16.msra.mxu0 %v2176_v43 }
 0x2cd   :  { %1909 = vmatprep.subr.bf16.mxu0 %v1996_v1 }
 0x382   :  { %v576_v35 = vpop.f32.mrb[18].mxu0 }
 0x383   :  { %v2326_v36 = vadd.f32 %v576_v35, %v259_v33  ;;  %v1552_v37 = vpop.f32.mrb[19].mxu0 }
 0x385   :  { %v581_v38 = vmax.f32 %v2326_v36, 0.0 }
 0x387   :  { %1586 = vmatmul.mubr.f32.vlgmr.msra.gmra.mrb[4].mxu1 %v581_v38  ;;  %v871_v50 = vpack.c.bf16 %v581_v38, %v509_v32 }
 0x388   :  { %1887 = vmatpush3.bf16.msra.mxu1 %v2065_v8  ;;  %1655 = vmatprep.mubr.msk.f32.mxu1 %vm1997_vm0, %v1998_v2 }
 0x389   :  { %1888 = vmatprep.subr.bf16.mxu1 %v1996_v1 }
 0x38c   :  { %1890 = vmatpush3.bf16.msra.mxu1 %v2081_v13 }
 0x38d   :  { %1891 = vmatprep.subr.bf16.mxu1 %v1996_v1 }
 0x390   :  { %1893 = vmatpush3.bf16.msra.mxu1 %v2096_v18 }
 0x391   :  { %1894 = vmatprep.subr.bf16.mxu1 %v1996_v1 }
 0x394   :  { %1896 = vmatpush3.bf16.msra.mxu1 %v2115_v24 }
 0x395   :  { %1897 = vmatprep.subr.bf16.mxu1 %v1996_v1 }
 0x398   :  { %1899 = vmatpush3.bf16.msra.mxu1 %v2128_v28 }
 0x399   :  { %1900 = vmatprep.subr.bf16.mxu1 %v1996_v1 }
 0x39c   :  { %1902 = vmatpush3.bf16.msra.mxu1 %v2147_v34 }
 0x39d   :  { %1903 = vmatprep.subr.bf16.mxu1 %v1996_v1 }
 0x3a0   :  { %1905 = vmatpush3.bf16.msra.mxu1 %v2163_v39 }
 0x3a1   :  { %1906 = vmatprep.subr.bf16.mxu1 %v1996_v1 }
 0x3a4   :  { %1908 = vmatpush3.bf16.msra.mxu1 %v2176_v43 }
 0x45a   :  { %v648_v41 = vpop.f32.mrb[4].mxu1 }
 0x45b   :  { %v652_v42 = vadd.f32 %v648_v41, %v264_v40  ;;  %v1587_v44 = vpop.f32.mrb[5].mxu1 }
 0x45d   :  { %v653_v45 = vmax.f32 %v652_v42, 0.0 }
 0x45f   :  { %1621 = vmatmul.mubr.f32.vlgmr.msra.gmra.mrb[20].mxu0 %v653_v45 }
 0x460   :  { %1911 = vmatpush3.bf16.msra.mxu0 %v2065_v8  ;;  %1690 = vmatprep.mubr.msk.f32.mxu0 %vm1997_vm0, %v1998_v2  ;;  %v1980_v2 = vld [vmem:[%s2463_s4] sm:$0xff]   ;;  %v267_v8 = vadd.f32 %v2259_v12, %v2240_v52 }
 0x461   :  { %1912 = vmatprep.subr.bf16.mxu0 %v1996_v1  ;;  %1693 = vmatprep.subr.bf16.mxu1 %v1980_v2 }
 0x464   :  { %1914 = vmatpush3.bf16.msra.mxu0 %v2081_v13 }
 0x465   :  { %1915 = vmatprep.subr.bf16.mxu0 %v1996_v1 }
 0x468   :  { %1917 = vmatpush3.bf16.msra.mxu0 %v2096_v18 }
 0x469   :  { %1918 = vmatprep.subr.bf16.mxu0 %v1996_v1 }
 0x46c   :  { %1920 = vmatpush3.bf16.msra.mxu0 %v2115_v24 }
 0x46d   :  { %1921 = vmatprep.subr.bf16.mxu0 %v1996_v1 }
 0x470   :  { %1923 = vmatpush3.bf16.msra.mxu0 %v2128_v28 }
 0x471   :  { %1924 = vmatprep.subr.bf16.mxu0 %v1996_v1 }
 0x474   :  { %1926 = vmatpush3.bf16.msra.mxu0 %v2147_v34  ;;  %v1981_v34 = vld [vmem:[%s2463_s4 + $0x8] sm:$0xff]  }
 0x475   :  { %1927 = vmatprep.subr.bf16.mxu0 %v1996_v1 }
 0x478   :  { %1929 = vmatpush3.bf16.msra.mxu0 %v2163_v39  ;;  %v1982_v39 = vld [vmem:[%s2463_s4 + $0x10] sm:$0xff]  }
 0x479   :  { %1930 = vmatprep.subr.bf16.mxu0 %v1996_v1  ;;  %v870_v1 = vpack.c.bf16 %v437_v26, %v365_v61  ;;  %v272_v61 = vadd.f32 %v2264_v16, %v2240_v52 }
 0x47c   :  { %1932 = vmatpush3.bf16.msra.mxu0 %v2176_v43  ;;  %v1983_v43 = vld [vmem:[%s2463_s4 + $0x18] sm:$0xff]  }
 0x47d   :  { %1717 = vmatprep.subr.bf16.mxu0 %v1988_v53 }
 0x532   :  { %v720_v13 = vpop.f32.mrb[20].mxu0 }
 0x533   :  { %v724_v18 = vadd.f32 %v720_v13, %v267_v8  ;;  %v1622_v24 = vpop.f32.mrb[21].mxu0 }
 0x535   :  { %v725_v28 = vmax.f32 %v724_v18, 0.0 }
 0x537   :  { %1656 = vmatmul.mubr.f32.vlgmr.msra.gmra.mrb[6].mxu1 %v725_v28  ;;  %v872_v51 = vpack.c.bf16 %v725_v28, %v653_v45 }
 0x538   :  { %1694 = vmatpush3.bf16.msra.mxu1 %v1980_v2  ;;  %1709 = vmatprep.mubr.bf16.mxu1 %v870_v1 }
 0x539   :  { %1695 = vmatprep.subr.bf16.mxu1 %v1981_v34 }
 0x53c   :  { %1696 = vmatpush3.bf16.msra.mxu1 %v1981_v34 }
 0x53d   :  { %1697 = vmatprep.subr.bf16.mxu1 %v1982_v39 }
 0x540   :  { %1698 = vmatpush3.bf16.msra.mxu1 %v1982_v39 }
 0x541   :  { %1699 = vmatprep.subr.bf16.mxu1 %v1983_v43 }
 0x544   :  { %1700 = vmatpush3.bf16.msra.mxu1 %v1983_v43 }
 0x545   :  { %1701 = vmatprep.subr.bf16.mxu1 %v1984_v46 }
 0x548   :  { %1702 = vmatpush3.bf16.msra.mxu1 %v1984_v46 }
 0x549   :  { %1703 = vmatprep.subr.bf16.mxu1 %v1985_v47 }
 0x54c   :  { %1704 = vmatpush3.bf16.msra.mxu1 %v1985_v47 }
 0x54d   :  { %1705 = vmatprep.subr.bf16.mxu1 %v1986_v48 }
 0x550   :  { %1706 = vmatpush3.bf16.msra.mxu1 %v1986_v48 }
 0x551   :  { %1707 = vmatprep.subr.bf16.mxu1 %v1987_v49 }
 0x554   :  { %1708 = vmatpush3.bf16.msra.mxu1 %v1987_v49 }
 0x555   :  { %1933 = vmatprep.subr.bf16.mxu1 %v1988_v53 }
 0x557   :  { %1710 = vmatmul.mubr.bf16.vlgmr.msra.gmra.mrb[8].mxu1 %v871_v50 }
 0x558   :  { %1713 = vmatprep.mubr.bf16.mxu1 %v872_v51  ;;  %1941 = vmatpush3.bf16.msra.mxu1 %v1988_v53 }
 0x559   :  { %1934 = vmatprep.subr.bf16.mxu1 %v1989_v54 }
 0x55c   :  { %1942 = vmatpush3.bf16.msra.mxu1 %v1989_v54 }
 0x55d   :  { %1935 = vmatprep.subr.bf16.mxu1 %v1990_v55 }
 0x560   :  { %1943 = vmatpush3.bf16.msra.mxu1 %v1990_v55 }
 0x561   :  { %1936 = vmatprep.subr.bf16.mxu1 %v1991_v56 }
 0x564   :  { %1944 = vmatpush3.bf16.msra.mxu1 %v1991_v56 }
 0x565   :  { %1937 = vmatprep.subr.bf16.mxu1 %v1992_v57 }
 0x568   :  { %1945 = vmatpush3.bf16.msra.mxu1 %v1992_v57 }
 0x569   :  { %1938 = vmatprep.subr.bf16.mxu1 %v1993_v58 }
 0x56c   :  { %1946 = vmatpush3.bf16.msra.mxu1 %v1993_v58 }
 0x56d   :  { %1939 = vmatprep.subr.bf16.mxu1 %v1994_v59 }
 0x570   :  { %1947 = vmatpush3.bf16.msra.mxu1 %v1994_v59 }
 0x571   :  { %1940 = vmatprep.subr.bf16.mxu1 %v1995_v60 }
 0x574   :  { %1948 = vmatpush3.bf16.msra.mxu1 %v1995_v60 }
 0x60a   :  { %v792_v62 = vpop.f32.mrb[6].mxu1 }
 0x60b   :  { %v796_v63 = vadd.f32 %v792_v62, %v272_v61  ;;  %v1657_v0 = vpop.f32.mrb[7].mxu1 }
 0x60d   :  { %v797_v3 = vmax.f32 %v796_v63, 0.0 }
 0x60f   :  { %1691 = vmatmul.mubr.f32.vlgmr.msra.gmra.mrb[22].mxu0 %v797_v3 }
 0x610   :  { %1718 = vmatpush3.bf16.msra.mxu0 %v1988_v53 }
 0x611   :  { %1719 = vmatprep.subr.bf16.mxu0 %v1989_v54 }
 0x614   :  { %1720 = vmatpush3.bf16.msra.mxu0 %v1989_v54 }
 0x615   :  { %1721 = vmatprep.subr.bf16.mxu0 %v1990_v55 }
 0x618   :  { %1722 = vmatpush3.bf16.msra.mxu0 %v1990_v55 }
 0x619   :  { %1723 = vmatprep.subr.bf16.mxu0 %v1991_v56 }
 0x61c   :  { %1724 = vmatpush3.bf16.msra.mxu0 %v1991_v56 }
 0x61d   :  { %1725 = vmatprep.subr.bf16.mxu0 %v1992_v57 }
 0x620   :  { %1726 = vmatpush3.bf16.msra.mxu0 %v1992_v57 }
 0x621   :  { %1727 = vmatprep.subr.bf16.mxu0 %v1993_v58 }
 0x624   :  { %1728 = vmatpush3.bf16.msra.mxu0 %v1993_v58 }
 0x625   :  { %1729 = vmatprep.subr.bf16.mxu0 %v1994_v59 }
 0x628   :  { %1730 = vmatpush3.bf16.msra.mxu0 %v1994_v59 }
 0x629   :  { %1731 = vmatprep.subr.bf16.mxu0 %v1995_v60 }
 0x62a   :  { %v1711_v5 = vpop.f32.mrb[8].mxu1 }
 0x62b   :  { %v988_v6 = vadd.f32 %v1711_v5, %v1195_v4  ;;  %v979_v7 = vpop.f32.mrb[9].mxu1 }
 0x62c   :  { %v980_v9 = vadd.f32 %v1195_v4, %v979_v7  ;;  %v1712_v10 = vpop.f32.mrb[10].mxu1  ;;  %1732 = vmatpush3.bf16.msra.mxu0 %v1995_v60 }
 0x62d   :  { %v991_v11 = vadd.f32 %v1712_v10, %v1195_v4  ;;  %v982_v12 = vpop.f32.mrb[11].mxu1  ;;  %v1012_v15 = vmax.f32 %v988_v6, 0.0 }
 0x62e   :  { %v983_v14 = vadd.f32 %v1195_v4, %v982_v12  ;;  %v1010_v17 = vmax.f32 %v980_v9, 0.0 }
 0x62f   :  { %v1013_v16 = vmax.f32 %v991_v11, 0.0 }
 0x630   :  { %v1011_v19 = vmax.f32 %v983_v14, 0.0 }
 0x631   :  { %v1019_v21 = vpack.c.bf16 %v1013_v16, %v1012_v15 }
 0x632   :  { %v1018_v22 = vpack.c.bf16 %v1011_v19, %v1010_v17 }
 0x634   :  { %1733 = vmatprep.mubr.bf16.mxu0 %v1018_v22 }
 0x635   :  { %1734 = vmatmul.mubr.bf16.vlgmr.msra.gmra.mrb[24].mxu0 %v1019_v21 }
 0x6e2   :  { %v864_v25 = vpop.f32.mrb[22].mxu0 }
 0x6e3   :  { %v868_v26 = vadd.f32 %v864_v25, %v275_v23  ;;  %v1692_v27 = vpop.f32.mrb[23].mxu0 }
 0x6e5   :  { %v869_v29 = vmax.f32 %v868_v26, 0.0 }
 0x6e7   :  { %v873_v30 = vpack.c.bf16 %v869_v29, %v797_v3 }
 0x6e9   :  { %1714 = vmatmul.mubr.bf16.gmra.mrb[12].mxu1 %v873_v30 }
 0x708   :  { %v1735_v32 = vpop.f32.mrb[24].mxu0 }
 0x709   :  { %v1136_v33 = vadd.f32 %v1735_v32, %v1204_v31  ;;  %v1127_v35 = vpop.f32.mrb[25].mxu0 }
 0x70a   :  { %v1128_v36 = vadd.f32 %v1204_v31, %v1127_v35  ;;  %v1736_v37 = vpop.f32.mrb[26].mxu0 }
 0x70b   :  { %1160 = vst [vmem:[%s2467_s8 + $0x10] sm:$0xff] %v1136_v33  ;;  %v1139_v52 = vadd.f32 %v1736_v37, %v1204_v31  ;;  %v1130_v20 = vpop.f32.mrb[27].mxu0 }
 0x70c   :  { %1158 = vst [vmem:[%s2467_s8] sm:$0xff] %v1128_v36  ;;  %v1131_v38 = vadd.f32 %v1204_v31, %v1130_v20 }
 0x70d   :  { %1161 = vst [vmem:[%s2467_s8 + $0x18] sm:$0xff] %v1139_v52 }
 0x70e   :  { %1159 = vst [vmem:[%s2467_s8 + $0x8] sm:$0xff] %v1131_v38 }
 0x7bc   :  { %v1715_v40 = vpop.f32.mrb[12].mxu1 }
 0x7bd   :  { %v1004_v41 = vadd.f32 %v1715_v40, %v1195_v4  ;;  %v995_v42 = vpop.f32.mrb[13].mxu1 }
 0x7be   :  { %v996_v44 = vadd.f32 %v1195_v4, %v995_v42  ;;  %v1716_v45 = vpop.f32.mrb[14].mxu1 }
 0x7bf   :  { %v1007_v2 = vadd.f32 %v1716_v45, %v1195_v4  ;;  %v998_v8 = vpop.f32.mrb[15].mxu1  ;;  %v1016_v18 = vmax.f32 %v1004_v41, 0.0 }
 0x7c0   :  { %v999_v13 = vadd.f32 %v1195_v4, %v998_v8  ;;  %v1014_v28 = vmax.f32 %v996_v44, 0.0 }
 0x7c1   :  { %v1017_v24 = vmax.f32 %v1007_v2, 0.0 }
 0x7c2   :  { %v1015_v34 = vmax.f32 %v999_v13, 0.0 }
 0x7c3   :  { %v1021_v1 = vpack.c.bf16 %v1017_v24, %v1016_v18 }
 0x7c4   :  { %v1020_v39 = vpack.c.bf16 %v1015_v34, %v1014_v28 }
 0x7c6   :  { %1737 = vmatprep.mubr.bf16.mxu1 %v1020_v39 }
 0x7c7   :  { %1738 = vmatmul.mubr.bf16.vlgmr.msra.gmra.mrb[16].mxu1 %v1021_v1 }
 0x89a   :  { %v1739_v43 = vpop.f32.mrb[16].mxu1 }
 0x89b   :  { %v1152_v46 = vadd.f32 %v1739_v43, %v1204_v31  ;;  %v1143_v47 = vpop.f32.mrb[17].mxu1 }
 0x89c   :  { %v1144_v48 = vadd.f32 %v1204_v31, %v1143_v47  ;;  %v1740_v49 = vpop.f32.mrb[18].mxu1 }
 0x89d   :  { %1164 = vst [vmem:[%s2467_s8 + $0x30] sm:$0xff] %v1152_v46  ;;  %v1155_v50 = vadd.f32 %v1740_v49, %v1204_v31  ;;  %v1146_v51 = vpop.f32.mrb[19].mxu1 }
 0x89e   :  { %1162 = vst [vmem:[%s2467_s8 + $0x20] sm:$0xff] %v1144_v48  ;;  %v1147_v53 = vadd.f32 %v1204_v31, %v1146_v51 }
 0x89f   :  { %1165 = vst [vmem:[%s2467_s8 + $0x38] sm:$0xff] %v1155_v50 }
 0x8a0   :  { %1163 = vst [vmem:[%s2467_s8 + $0x28] sm:$0xff] %v1147_v53 }

</bundles_post_ra>
